<compile_context>
chip_gen: v5e
topology: v5e:2x2
jax: 0.10.0
libtpu: 0.0.40
codegen_flags: <defaults>
</compile_context>

<pallas_src>
import functools

import jax
import jax.numpy as jnp
from jax import lax
from jax.experimental import pallas as pl
from jax.experimental.pallas import tpu as pltpu

_LANES = 128


# ----------------------------------------------------------------------------
# Pallas kernels
# ----------------------------------------------------------------------------
def _vector_field(t, y_bf16, w_bf16, b_f32):
    """tanh(y @ W + b + t), bf16 MXU operands, f32 accumulation."""
    z = jnp.dot(y_bf16, w_bf16, preferred_element_type=jnp.float32)
    return jnp.tanh(z + b_f32 + t)


def _ode_fwd_kernel(t_ref, y_ref, w_ref, b_ref, o_ref):
    """Forward only: o = f(t, y) for one lane-dense batch tile."""
    o_ref[...] = _vector_field(
        t_ref[0], y_ref[...], w_ref[...], b_ref[...]
    ).astype(o_ref.dtype)


def _ode_fwd_tie_kernel(t_ref, y_ref, w_ref, b_ref, xb_ref, o_ref, tied_ref):
    """Fused forward + tie_adjoints.

    Outputs:
      o_ref    : (bt, DP) var_dot tile (lane-dense).
      tied_ref : (1, bt) lane-layout row of per-batch sums
                 sum_d x_bar[j, d] * var_dot[j, d].
    """
    vdot = _vector_field(t_ref[0], y_ref[...], w_ref[...], b_ref[...])  # f32
    o_ref[...] = vdot.astype(o_ref.dtype)

    # tie_adjoints on the fresh VMEM tile (rides VPU/MXU slots, no HBM
    # round-trip of var_dot).  diag-of-Gram trick keeps everything 2-D and
    # lands the result directly in lane layout; padded feature lanes of x_bar
    # are zero so they contribute nothing.  At production batch sizes keep the
    # batch tile modest so the (bt, bt) Gram stays cheap.
    xb = xb_ref[...]                                                    # f32
    gram = lax.dot_general(
        xb, vdot, (((1,), (1,)), ((), ())),
        preferred_element_type=jnp.float32)                            # (bt, bt)
    rid = lax.broadcasted_iota(jnp.int32, gram.shape, 0)
    cid = lax.broadcasted_iota(jnp.int32, gram.shape, 1)
    diag = jnp.where(rid == cid, gram, jnp.zeros_like(gram))
    tied_ref[...] = jnp.sum(diag, axis=0, keepdims=True)               # (1, bt)


# ----------------------------------------------------------------------------
# Host-side operand prep (padding to lane-dense shapes, bf16 cast)
# ----------------------------------------------------------------------------
def _pad_last(x, dp):
    d = x.shape[-1]
    if d == dp:
        return x
    return jnp.pad(x, [(0, 0)] * (x.ndim - 1) + [(0, dp - d)])


def _prep_operands(t, y, w, b):
    assert not (jnp.iscomplexobj(y) or jnp.iscomplexobj(w) or jnp.iscomplexobj(b)), (
        "complex state not supported (Re(conj(x_bar)*x_dot) semantics omitted)")
    B, D = y.shape
    DP = pl.cdiv(max(D, _LANES), _LANES) * _LANES   # lane-dense feature width
    t_arr = jnp.asarray(t, jnp.float32).reshape((1,))
    y_p = _pad_last(y.astype(jnp.float32), DP).astype(jnp.bfloat16)       # (B, DP)
    w_p = jnp.pad(w.astype(jnp.float32),
                  ((0, DP - D), (0, DP - D))).astype(jnp.bfloat16)        # (DP, DP)
    b_p = _pad_last(b.reshape(1, D).astype(jnp.float32), DP)              # (1, DP)
    return B, D, DP, t_arr, y_p, w_p, b_p


def _batch_tile(B, batch_tile):
    bt = B if batch_tile is None else batch_tile
    assert B % bt == 0 and bt % 8 == 0
    return bt


# ----------------------------------------------------------------------------
# Pallas wrappers
# ----------------------------------------------------------------------------
def ode_func_pallas(t, y, w, b, *, batch_tile=None):
    """f(t, y) = tanh(y @ W + b + t).

    batch_tile=None -> one block for the whole batch (right for toy sizes).
    For production batches use 256-512 rows; the batch grid axis is marked
    "parallel" so it also shards across v7x's two TensorCores.
    """
    B, D, DP, t_arr, y_p, w_p, b_p = _prep_operands(t, y, w, b)
    bt = _batch_tile(B, batch_tile)

    out = pl.pallas_call(
        _ode_fwd_kernel,
        out_shape=jax.ShapeDtypeStruct((B, DP), jnp.float32),
        grid=(B // bt,),
        in_specs=[
            pl.BlockSpec(memory_space=pltpu.MemorySpace.SMEM),   # t (scalar)
            pl.BlockSpec((bt, DP), lambda i: (i, 0)),            # y tile (bf16)
            pl.BlockSpec((DP, DP), lambda i: (0, 0)),            # W (bf16, whole)
            pl.BlockSpec((1, DP), lambda i: (0, 0)),             # b (f32, whole)
        ],
        out_specs=pl.BlockSpec((bt, DP), lambda i: (i, 0)),      # lane-dense out
        compiler_params=pltpu.CompilerParams(
            dimension_semantics=("parallel",)),
    )(t_arr, y_p, w_p, b_p)
    return out[:, :D]


def ode_func_and_tie_adjoints_pallas(t, y, w, b, x_bar, *, batch_tile=None):
    """Fused var_dot = f(t, y) and tied = sum_d(x_bar * var_dot) per batch row.

    Note: with batch_tile < B the tied (1, bt) block needs bt to be a multiple
    of 128 for fully unmasked stores; batch_tile=None (single block) is used
    at toy sizes.
    """
    B, D, DP, t_arr, y_p, w_p, b_p = _prep_operands(t, y, w, b)
    assert not jnp.iscomplexobj(x_bar), "complex adjoint state not supported"
    xb_p = _pad_last(x_bar.reshape(B, -1).astype(jnp.float32), DP)        # (B, DP)
    bt = _batch_tile(B, batch_tile)

    var_dot_p, tied = pl.pallas_call(
        _ode_fwd_tie_kernel,
        out_shape=(jax.ShapeDtypeStruct((B, DP), jnp.float32),
                   jax.ShapeDtypeStruct((1, B), jnp.float32)),
        grid=(B // bt,),
        in_specs=[
            pl.BlockSpec(memory_space=pltpu.MemorySpace.SMEM),   # t (scalar)
            pl.BlockSpec((bt, DP), lambda i: (i, 0)),            # y tile (bf16)
            pl.BlockSpec((DP, DP), lambda i: (0, 0)),            # W (bf16, whole)
            pl.BlockSpec((1, DP), lambda i: (0, 0)),             # b (f32, whole)
            pl.BlockSpec((bt, DP), lambda i: (i, 0)),            # x_bar tile (f32)
        ],
        out_specs=(
            pl.BlockSpec((bt, DP), lambda i: (i, 0)),            # var_dot
            pl.BlockSpec((1, bt), lambda i: (0, i)),             # tied lane slab
        ),
        compiler_params=pltpu.CompilerParams(
            dimension_semantics=("parallel",)),
    )(t_arr, y_p, w_p, b_p, xb_p)
    return var_dot_p[:, :D], tied[0, :]


# ----------------------------------------------------------------------------
# Module analogue
# ----------------------------------------------------------------------------
class AdjModuleWrapperJax:
    """JAX/Pallas analogue of AdjModuleWrapper: forward delegates to `func`."""

    def __init__(self, func, num_samples=1):
        self.func = func
        self.num_samples = num_samples
        if hasattr(func, "calc_logj_rate"):
            self.calc_logj_rate = func.calc_logj_rate

    def forward(self, t, var, *args):
        return self.func(t, var, *args)

    __call__ = forward


# ----------------------------------------------------------------------------
# Main
# ----------------------------------------------------------------------------
if __name__ == "__main__":
    key = jax.random.PRNGKey(0)
    B, D = 16, 32  # small shapes: batch=16, hidden=32

    k1, k2, k3, k4 = jax.random.split(key, 4)
    y = jax.random.normal(k1, (B, D), jnp.float32)
    W = jax.random.normal(k2, (D, D), jnp.float32) / jnp.sqrt(D)
    b = jax.random.normal(k3, (D,), jnp.float32) * 0.1
    t = 0.5

    # Wrapped dynamics function (hot path runs in the Pallas kernel).
    func = functools.partial(
        lambda tt, yy, w_, b_: ode_func_pallas(tt, yy, w_, b_), w_=W, b_=b)
    adj_module = AdjModuleWrapperJax(func)

    var_dot = jax.block_until_ready(adj_module(t, y))

    # bf16-consistent reference for the forward pass (kernel feeds the MXU
    # bf16 operands with f32 accumulation).
    z_ref = jnp.dot(y.astype(jnp.bfloat16), W.astype(jnp.bfloat16),
                    preferred_element_type=jnp.float32)
    var_dot_ref = jnp.tanh(z_ref + b[None, :] + t)
    assert jnp.allclose(var_dot, var_dot_ref, atol=5e-3, rtol=5e-3), \
        "forward pass mismatch"

    # Fused forward + tie_adjoints (the dependent function used in aug_reverse).
    grad_var = jax.random.normal(k4, (B, D), jnp.float32)
    var_dot_f, tied = jax.block_until_ready(
        ode_func_and_tie_adjoints_pallas(t, y, W, b, grad_var))
    assert jnp.allclose(var_dot_f, var_dot, atol=1e-5, rtol=1e-5), \
        "fused forward differs from forward-only kernel"
    tied_ref = jnp.sum(grad_var * var_dot_f, axis=1)
    assert jnp.allclose(tied, tied_ref, atol=1e-3, rtol=1e-3), \
        "tie_adjoints mismatch"

    print("KERNEL_OK")
</pallas_src>

<mosaic_0001>
module attributes {stable_mosaic.version = 11 : i64} {
  func.func @_ode_fwd_kernel(%arg0: i32, %arg1: memref<1xf32, #tpu.memory_space<smem>>, %arg2: memref<16x128xbf16, #tpu.memory_space<vmem>>, %arg3: memref<128x128xbf16, #tpu.memory_space<vmem>>, %arg4: memref<1x128xf32, #tpu.memory_space<vmem>>, %arg5: memref<16x128xf32, #tpu.memory_space<vmem>>) attributes {dimension_semantics = [#tpu.dimension_semantics<parallel>], iteration_bounds = array<i64: 1>, scalar_prefetch = 0 : i64, scratch_operands = 0 : i64, tpu.core_type = #tpu.core_type<tc>, window_params = [{transform_indices = @transform_0, window_bounds = array<i64: 1>}, {transform_indices = @transform_1, window_bounds = array<i64: 16, 128>}, {pipeline_mode = #tpu.pipeline_mode<synchronous>, transform_indices = @transform_2, window_bounds = array<i64: 128, 128>}, {pipeline_mode = #tpu.pipeline_mode<synchronous>, transform_indices = @transform_3, window_bounds = array<i64: 1, 128>}, {transform_indices = @transform_4, window_bounds = array<i64: 16, 128>}]} {
    %c0 = arith.constant 0 : index
    %0 = memref.load %arg1[%c0] : memref<1xf32, #tpu.memory_space<smem>>
    %c0_0 = arith.constant 0 : index
    %c0_1 = arith.constant 0 : index
    %1 = vector.load %arg2[%c0_0, %c0_1] : memref<16x128xbf16, #tpu.memory_space<vmem>>, vector<16x128xbf16>
    %c0_2 = arith.constant 0 : index
    %c0_3 = arith.constant 0 : index
    %2 = vector.load %arg3[%c0_2, %c0_3] : memref<128x128xbf16, #tpu.memory_space<vmem>>, vector<128x128xbf16>
    %c0_4 = arith.constant 0 : index
    %c0_5 = arith.constant 0 : index
    %3 = vector.load %arg4[%c0_4, %c0_5] : memref<1x128xf32, #tpu.memory_space<vmem>>, vector<1x128xf32>
    %cst = arith.constant dense<0.000000e+00> : vector<16x128xf32>
    %4 = tpu.matmul %1, %2, %cst {dimension_numbers = #tpu.dot_dimension_numbers<[1], [0], [0], [1], [0, 0, 1, 1], [], []>} : vector<16x128xbf16>, vector<128x128xbf16>, vector<16x128xf32> -> vector<16x128xf32>
    %5 = vector.broadcast %3 : vector<1x128xf32> to vector<16x128xf32>
    %6 = arith.addf %4, %5 : vector<16x128xf32>
    %7 = vector.broadcast %0 : f32 to vector<16x128xf32>
    %8 = arith.addf %6, %7 : vector<16x128xf32>
    %9 = math.tanh %8 : vector<16x128xf32>
    %c0_6 = arith.constant 0 : index
    %c0_7 = arith.constant 0 : index
    %10 = vector.load %arg5[%c0_6, %c0_7] : memref<16x128xf32, #tpu.memory_space<vmem>>, vector<16x128xf32>
    tpu.vector_store %arg5[%c0_6, %c0_7], %9 {strides = array<i32>} : memref<16x128xf32, #tpu.memory_space<vmem>>, vector<16x128xf32>,
    return
  }
  func.func @transform_0(%arg0: i32) -> i32 {
    %c0_i32 = arith.constant 0 : i32
    %c0_i32_0 = arith.constant 0 : i32
    return %c0_i32 : i32
  }
  func.func @transform_1(%arg0: i32) -> (i32, i32) {
    %c0_i32 = arith.constant 0 : i32
    %c0_i32_0 = arith.constant 0 : i32
    return %arg0, %c0_i32 : i32, i32
  }
  func.func @transform_2(%arg0: i32) -> (i32, i32) {
    %c0_i32 = arith.constant 0 : i32
    %c0_i32_0 = arith.constant 0 : i32
    %c0_i32_1 = arith.constant 0 : i32
    return %c0_i32, %c0_i32_0 : i32, i32
  }
  func.func @transform_3(%arg0: i32) -> (i32, i32) {
    %c0_i32 = arith.constant 0 : i32
    %c0_i32_0 = arith.constant 0 : i32
    %c0_i32_1 = arith.constant 0 : i32
    return %c0_i32, %c0_i32_0 : i32, i32
  }
  func.func @transform_4(%arg0: i32) -> (i32, i32) {
    %c0_i32 = arith.constant 0 : i32
    %c0_i32_0 = arith.constant 0 : i32
    return %arg0, %c0_i32 : i32, i32
  }
}

</mosaic_0001>

<bundles_post_ra>
// kernel: tpu_custom_call.1
= control target key start
LH: loop header
LB: loop body
LE: loop exit
PB: predicated region body
PF: predicated region fallthrough
CT: control target
= control target key end

     0   :  { %10 = vsyncpa [#allocation4], 0  ;;  %s351_s0 = inlined_call_operand.<no memory space> [shape: f32[1], index: 0, kind: input, shape index: {}]   ;;  %s352_s1 = inlined_call_operand.hbm [shape: bf16[16,128], index: 1, kind: input, shape index: {}]   ;;  %s353_s2 = inlined_call_operand.hbm [shape: bf16[128,128], index: 2, kind: input, shape index: {}]   ;;  %s354_s3 = inlined_call_operand.vmem [shape: f32[1,128], index: 3, kind: input, shape index: {}]   ;;  %s355_s4 = inlined_call_operand.hbm [shape: f32[16,128], index: 4, kind: output, shape index: {}]  }
   0x1   :  { %11 = vsyncpa [#allocation7], 0 }
   0x2   :  { %12 = vsyncpa [#allocation5], 0  ;;  %s19_s17 = sshll.u32 %s352_s1, 4  ;;  %s304_s18 = smov [#allocation3]   ;;  %s20_s17 = int_to_ptr.hbm [resolvable:$true] %s19_s17 }
   0x3   :  { %s21_s19 = sshll.u32 %s304_s18, 4  ;;  %s32_s22 = sshll.u32 %s353_s2, 4  ;;  %s22_s19 = int_to_ptr.vmem [resolvable:$true] %s21_s19  ;;  %s33_s22 = int_to_ptr.hbm [resolvable:$true] %s32_s22 }
   0x4   :  { %s305_s23 = smov 64   ;;  %s306_s24 = smov 4  }
   0x5   :  { %27 = dma.hbm_to_vmem [thread:$0]  %s20_s17, 128, %s22_s19, [#allocation4], %s305_s23, %s305_s23, %s306_s24  }
   0x6   :  { %s307_s25 = smov [#allocation6]  }
   0x7   :  { %s34_s26 = sshll.u32 %s307_s25, 4  ;;  %s35_s26 = int_to_ptr.vmem [resolvable:$true] %s34_s26 }
   0x8   :  { %40 = dma.hbm_to_vmem [thread:$0]  %s33_s22, 1024, %s35_s26, [#allocation7], %s305_s23, %s305_s23, %s306_s24  }
   0x9   :  { %298 = dma.done.wait [#allocation4], 128  }
   0xa   :  { %299 = vsyncadd [#allocation4], 4294967168 }
   0xb   :  { %300 = dma.done.wait [#allocation7], 1024  }
   0xc   :  { %301 = vsyncadd [#allocation7], 4294966272  ;;  %v213_v0 = vld [vmem:[#allocation6 + $0x38] sm:$0xff]  ;;  %v212_v1 = vld [vmem:[#allocation6 + $0x30] sm:$0xff]  ;;  %v142_v11 = vstv %s351_s0  ;;  %s308_s29 = smov [#allocation8]   ;;  %s309_s0 = smov 128  }
   0xd   :  { %128 = vmatpush.bf16.msra.mxu0 %v213_v0  ;;  %v211_v2 = vld [vmem:[#allocation6 + $0x28] sm:$0xff]  ;;  %v210_v3 = vld [vmem:[#allocation6 + $0x20] sm:$0xff]  ;;  %v209_v4 = vld [vmem:[#allocation6 + $0x18] sm:$0xff]  ;;  %s153_s30 = sshll.u32 %s308_s29, 4  ;;  %s310_s7 = smov 8   ;;  %s154_s30 = int_to_ptr.vmem [resolvable:$true] %s153_s30 }
   0xe   :  { %v208_v5 = vld [vmem:[#allocation6 + $0x10] sm:$0xff]  ;;  %v207_v6 = vld [vmem:[#allocation6 + $0x8] sm:$0xff]  ;;  %v206_v7 = vld [vmem:[#allocation6] sm:$0xff] }
   0xf   :  { %v205_v8 = vld [vmem:[#allocation3] sm:$0xff] }
  0x10   :  { %v221_v9 = vld [vmem:[%s354_s3] ss:$0 sm:$0xff]  ;;  %s155_s3 = sshll.u32 %s355_s4, 4  ;;  %s156_s3 = int_to_ptr.hbm [resolvable:$true] %s155_s3 }
  0x11   :  { %129 = vmatpush.bf16.msra.mxu0 %v212_v1 }
  0x15   :  { %130 = vmatpush.bf16.msra.mxu0 %v211_v2 }
  0x19   :  { %131 = vmatpush.bf16.msra.mxu0 %v210_v3 }
  0x1d   :  { %132 = vmatpush.bf16.msra.mxu0 %v209_v4 }
  0x21   :  { %133 = vmatpush.bf16.msra.mxu0 %v208_v5 }
  0x25   :  { %134 = vmatpush.bf16.msra.mxu0 %v207_v6 }
  0x29   :  { %135 = vmatpush.bf16.msra.mxu0 %v206_v7 }
  0x2c   :  { %136 = vmatmul.bf16.vlgmr.msra.gmra.mxu0 %v205_v8 }
  0xa9   :  { %v137_v10 = vpop.f32.mrf.mxu0 }
  0xaa   :  { %v138_v12 = vadd.f32 %v221_v9, %v137_v10 }
  0xac   :  { %v143_v13 = vadd.f32 %v142_v11, %v138_v12 }
  0xae   :  { %222 = vtanh.f32 %v143_v13 }
  0xb1   :  { %v139_v14 = vpop.f32.mrf.mxu0 }
  0xb2   :  { %v140_v15 = vadd.f32 %v221_v9, %v139_v14 }
  0xb4   :  { %v223_v16 = vpop.eup %222  ;;  %v144_v17 = vadd.f32 %v142_v11, %v140_v15 }
  0xb5   :  { %147 = vst [vmem:[#allocation8] sm:$0xff] %v223_v16 }
  0xb6   :  { %224 = vtanh.f32 %v144_v17 }
  0xbc   :  { %v225_v18 = vpop.eup %224 }
  0xbd   :  { %148 = vst [vmem:[#allocation8 + $0x8] sm:$0xff] %v225_v18 }
  0xbe   :  { %161 = dma.vmem_to_hbm [thread:$0]  %s154_s30, 256, %s156_s3, [#allocation5], %s309_s0, %s309_s0, %s310_s7  }
  0xbf   :  { %302 = dma.done.wait [#allocation5], 256  }
  0xc0   :  { %303 = vsyncadd [#allocation5], 4294967040 }
  0xc1   :  { %166 = vsyncpa [#allocation4], 1 }
  0xc2   :  { %167 = vsyncpa [#allocation7], 1 }
  0xc3   :  { %168 = vsyncpa [#allocation5], 1 }

</bundles_post_ra>
